<compile_context>
chip_gen: v6e
topology: v6e:2x2x1
jax: 0.10.0
libtpu: 0.0.40
codegen_flags: <defaults>
</compile_context>

<pallas_src>
import jax
import jax.numpy as jnp
import numpy as np
from jax.experimental import pallas as pl
from jax.experimental.pallas import tpu as pltpu


def fused_gat_kernel(x_ref, w_ref, b_ref, a_src_ref, a_dst_ref,
                     expand_ref, chunk_sum_ref, row_ref, col_ref, valid_ref,
                     out_ref):
    N = x_ref.shape[0]
    E = row_ref.shape[0]
    R = valid_ref.shape[1]

    x = x_ref[...]                                                   # (N, Fin)
    # h for all relations at once: (N, R*H)
    h_all = jnp.dot(x, w_ref[...],
                    preferred_element_type=jnp.float32) + b_ref[...]

    # per-node, per-relation attention scores (feedback #2: no h_row gather)
    s_src = jnp.dot(h_all, a_src_ref[...],
                    preferred_element_type=jnp.float32)              # (N, R)
    s_dst = jnp.dot(h_all, a_dst_ref[...],
                    preferred_element_type=jnp.float32)              # (N, R)

    # one-hot gather/scatter matrices, built once (relation invariant)
    node_ids = jax.lax.broadcasted_iota(jnp.int32, (E, N), 1)
    oh_row = (row_ref[...] == node_ids).astype(jnp.float32)          # (E, N)
    oh_col = (col_ref[...] == node_ids).astype(jnp.float32)          # (E, N)

    # e[e, r] = s_src[row[e], r] + s_dst[col[e], r]  (gathers as MXU matmuls)
    e = (jnp.dot(oh_row, s_src, preferred_element_type=jnp.float32)
         + jnp.dot(oh_col, s_dst, preferred_element_type=jnp.float32))
    e = jnp.where(e > 0, e, 0.2 * e)                                 # LeakyReLU(0.2)

    valid = valid_ref[...]                                           # (E, R)
    NEG = jnp.float32(-1e30)
    e_m = jnp.where(valid > 0, e, NEG)

    # per-target-node (segment) max, per relation -- only true XLU reduction
    m_rows = []
    for r in range(R):                                               # R small & static
        bc = jnp.where(oh_row > 0, e_m[:, r:r + 1], NEG)             # (E, N)
        m_rows.append(jnp.max(bc, axis=0, keepdims=True))            # (1, N)
    m_node = jnp.concatenate(m_rows, axis=0)                         # (R, N)

    # m_edge[e, r] = m_node[r, row[e]]  ==  oh_row @ m_node.T   (MXU, feedback #3)
    m_edge = jax.lax.dot_general(
        oh_row, m_node, (((1,), (1,)), ((), ())),
        preferred_element_type=jnp.float32)                          # (E, R)

    # exp argument is <= 0 mathematically; clamp so MXU rounding of the -1e30
    # sentinel can never yield exp(+big) = inf (then inf * 0 = NaN).
    p = jnp.exp(jnp.minimum(e_m - m_edge, 0.0)) * valid              # (E, R)

    # segment sums on the MXU (feedback #3)
    denom_node = jax.lax.dot_general(
        oh_row, p, (((0,), (0,)), ((), ())),
        preferred_element_type=jnp.float32)                          # (N, R)
    denom_edge = jnp.dot(oh_row, denom_node,
                         preferred_element_type=jnp.float32)         # (E, R)
    alpha = p * pl.reciprocal(denom_edge + jnp.float32(1e-16),
                              approx=True)                           # (E, R)  (feedback #8)

    # messages: h[col] for every relation, scaled by that relation's alpha
    h_col_all = jnp.dot(oh_col, h_all,
                        preferred_element_type=jnp.float32)          # (E, R*H)
    alpha_exp = jnp.dot(alpha, expand_ref[...],
                        preferred_element_type=jnp.float32)          # (E, R*H)
    msg_all = h_col_all * alpha_exp                                  # (E, R*H)

    # sum the R relation chunks per edge, then scatter-add by target node
    msg = jnp.dot(msg_all, chunk_sum_ref[...],
                  preferred_element_type=jnp.float32)                # (E, H)
    out_ref[...] = jax.lax.dot_general(
        oh_row, msg, (((0,), (0,)), ((), ())),
        preferred_element_type=jnp.float32)                          # (N, H)


def relational_gat_forward(x, w, b, a_param, row, col, edge_type):
    """x:(N,Fin) w:(R,Fin,H) b:(R,1,H) a_param:(1,2H) row/col/edge_type:(E,)."""
    N, Fin = x.shape
    R, _, H = w.shape
    E = row.shape[0]
    RH = R * H

    # Pack the per-relation Linear layers: h_all = x @ w_all + b_all, (N, R*H).
    w_all = jnp.transpose(w, (1, 0, 2)).reshape(Fin, RH)
    b_all = b.reshape(1, RH)

    # Split attention vector a (= a[0] in the module) into src/dst halves and
    # lay them out block-diagonally so per-node scores for all relations come
    # from a single (N,RH)x(RH,R) matmul (feedback #2).
    a_vec = a_param[0]
    eye_r = jnp.eye(R, dtype=jnp.float32)
    a_src_bd = jnp.kron(eye_r, a_vec[:H][:, None])                   # (RH, R)
    a_dst_bd = jnp.kron(eye_r, a_vec[H:][:, None])                   # (RH, R)

    # Selector matrices: broadcast per-relation alpha across its H lanes, and
    # sum the R relation chunks back down to H lanes -- both as MXU matmuls.
    expand = jnp.kron(eye_r, jnp.ones((1, H), jnp.float32))          # (R, RH)
    chunk_sum = jnp.tile(jnp.eye(H, dtype=jnp.float32), (R, 1))      # (RH, H)

    valid = (edge_type[:, None] == jnp.arange(R, dtype=jnp.int32)[None, :])
    valid = valid.astype(jnp.float32)                                # (E, R)
    row2d = row.astype(jnp.int32)[:, None]                           # (E, 1)
    col2d = col.astype(jnp.int32)[:, None]                           # (E, 1)

    def _spec(shape):
        return pl.BlockSpec(shape, lambda i, _r=len(shape): (0,) * _r)

    return pl.pallas_call(
        fused_gat_kernel,
        out_shape=jax.ShapeDtypeStruct((N, H), jnp.float32),
        grid=(1,),                                                   # fully fused (feedback #4)
        in_specs=[
            _spec((N, Fin)),      # x
            _spec((Fin, RH)),     # w_all
            _spec((1, RH)),       # b_all
            _spec((RH, R)),       # a_src_bd
            _spec((RH, R)),       # a_dst_bd
            _spec((R, RH)),       # expand
            _spec((RH, H)),       # chunk_sum
            _spec((E, 1)),        # row
            _spec((E, 1)),        # col
            _spec((E, R)),        # valid
        ],
        out_specs=_spec((N, H)),
        compiler_params=pltpu.CompilerParams(
            dimension_semantics=("arbitrary",),
            # explicit VMEM budget (feedback #7); trivial here, but stated so
            # the (E, N) one-hots get re-budgeted when E/N grow (v7x: 64 MiB).
            vmem_limit_bytes=32 * 1024 * 1024),
    )(x, w_all, b_all, a_src_bd, a_dst_bd, expand, chunk_sum,
      row2d, col2d, valid)


def reference_forward(x, w, b, a_param, row, col, edge_type, num_relations):
    """Pure-JAX reference mirroring the PyTorch forward (eval mode), summed over relations."""
    N = x.shape[0]
    H = w.shape[2]
    a = a_param[0]                                    # a = a[0], shape (2H,)
    out = jnp.zeros((N, H), jnp.float32)
    for r in range(num_relations):
        mask = edge_type == r
        h = x @ w[r] + b[r, 0]
        e = h[row] @ a[:H] + h[col] @ a[H:]
        e = jnp.where(e > 0, e, 0.2 * e)
        e = jnp.where(mask, e, -jnp.inf)
        m = jax.ops.segment_max(e, row, num_segments=N)
        m = jnp.where(jnp.isfinite(m), m, 0.0)
        p = jnp.where(mask, jnp.exp(e - m[row]), 0.0)
        denom = jax.ops.segment_sum(p, row, num_segments=N)
        alpha = p / (denom[row] + 1e-16)
        out = out + jax.ops.segment_sum(h[col] * alpha[:, None], row,
                                        num_segments=N)
    return out                                        # dropout: identity in eval


if __name__ == "__main__":
    # Small shapes implied by the module: N nodes, F_in features, out_dim hidden
    # (H = out_dim // 2), R relations, E edges.
    N, Fin, out_dim, R, E = 16, 32, 32, 3, 32
    H = out_dim // 2

    key = jax.random.PRNGKey(0)
    ks = jax.random.split(key, 7)
    x = jax.random.normal(ks[0], (N, Fin), jnp.float32)
    w = jax.random.normal(ks[1], (R, Fin, H), jnp.float32) * 0.1
    b = jax.random.normal(ks[2], (R, 1, H), jnp.float32) * 0.1
    a_param = jax.random.normal(ks[3], (1, out_dim), jnp.float32) * 0.1
    row = jax.random.randint(ks[4], (E,), 0, N, jnp.int32)
    col = jax.random.randint(ks[5], (E,), 0, N, jnp.int32)
    edge_type = jax.random.randint(ks[6], (E,), 0, R, jnp.int32)

    out = relational_gat_forward(x, w, b, a_param, row, col, edge_type)
    out = jax.block_until_ready(out)

    ref = reference_forward(x, w, b, a_param, row, col, edge_type, R)
    ref = jax.block_until_ready(ref)

    np.testing.assert_allclose(np.asarray(out), np.asarray(ref),
                               rtol=2e-3, atol=2e-3)
    print("KERNEL_OK")
</pallas_src>

<mosaic_0001>
module attributes {stable_mosaic.version = 11 : i64} {
  func.func @fused_gat_kernel(%arg0: i32, %arg1: memref<16x32xf32, #tpu.memory_space<vmem>>, %arg2: memref<32x48xf32, #tpu.memory_space<vmem>>, %arg3: memref<1x48xf32, #tpu.memory_space<vmem>>, %arg4: memref<48x3xf32, #tpu.memory_space<vmem>>, %arg5: memref<48x3xf32, #tpu.memory_space<vmem>>, %arg6: memref<3x48xf32, #tpu.memory_space<vmem>>, %arg7: memref<48x16xf32, #tpu.memory_space<vmem>>, %arg8: memref<32x1xi32, #tpu.memory_space<vmem>>, %arg9: memref<32x1xi32, #tpu.memory_space<vmem>>, %arg10: memref<32x3xf32, #tpu.memory_space<vmem>>, %arg11: memref<16x16xf32, #tpu.memory_space<vmem>>) attributes {dimension_semantics = [#tpu.dimension_semantics<arbitrary>], iteration_bounds = array<i64: 1>, scalar_prefetch = 0 : i64, scratch_operands = 0 : i64, tpu.core_type = #tpu.core_type<tc>, window_params = [{pipeline_mode = #tpu.pipeline_mode<synchronous>, transform_indices = @transform_0, window_bounds = array<i64: 16, 32>}, {pipeline_mode = #tpu.pipeline_mode<synchronous>, transform_indices = @transform_1, window_bounds = array<i64: 32, 48>}, {pipeline_mode = #tpu.pipeline_mode<synchronous>, transform_indices = @transform_2, window_bounds = array<i64: 1, 48>}, {pipeline_mode = #tpu.pipeline_mode<synchronous>, transform_indices = @transform_3, window_bounds = array<i64: 48, 3>}, {pipeline_mode = #tpu.pipeline_mode<synchronous>, transform_indices = @transform_4, window_bounds = array<i64: 48, 3>}, {pipeline_mode = #tpu.pipeline_mode<synchronous>, transform_indices = @transform_5, window_bounds = array<i64: 3, 48>}, {pipeline_mode = #tpu.pipeline_mode<synchronous>, transform_indices = @transform_6, window_bounds = array<i64: 48, 16>}, {pipeline_mode = #tpu.pipeline_mode<synchronous>, transform_indices = @transform_7, window_bounds = array<i64: 32, 1>}, {pipeline_mode = #tpu.pipeline_mode<synchronous>, transform_indices = @transform_8, window_bounds = array<i64: 32, 1>}, {pipeline_mode = #tpu.pipeline_mode<synchronous>, transform_indices = @transform_9, window_bounds = array<i64: 32, 3>}, {pipeline_mode = #tpu.pipeline_mode<synchronous>, transform_indices = @transform_10, window_bounds = array<i64: 16, 16>}]} {
    %c0 = arith.constant 0 : index
    %c0_0 = arith.constant 0 : index
    %0 = vector.load %arg1[%c0, %c0_0] : memref<16x32xf32, #tpu.memory_space<vmem>>, vector<16x32xf32>
    %c0_1 = arith.constant 0 : index
    %c0_2 = arith.constant 0 : index
    %1 = vector.load %arg2[%c0_1, %c0_2] : memref<32x48xf32, #tpu.memory_space<vmem>>, vector<32x48xf32>
    %cst = arith.constant dense<0.000000e+00> : vector<16x48xf32>
    %2 = tpu.matmul %0, %1, %cst {dimension_numbers = #tpu.dot_dimension_numbers<[1], [0], [0], [1], [0, 0, 1, 1], [], []>} : vector<16x32xf32>, vector<32x48xf32>, vector<16x48xf32> -> vector<16x48xf32>
    %c0_3 = arith.constant 0 : index
    %c0_4 = arith.constant 0 : index
    %3 = vector.load %arg3[%c0_3, %c0_4] : memref<1x48xf32, #tpu.memory_space<vmem>>, vector<1x48xf32>
    %4 = vector.broadcast %3 : vector<1x48xf32> to vector<16x48xf32>
    %5 = arith.addf %2, %4 : vector<16x48xf32>
    %c0_5 = arith.constant 0 : index
    %c0_6 = arith.constant 0 : index
    %6 = vector.load %arg4[%c0_5, %c0_6] : memref<48x3xf32, #tpu.memory_space<vmem>>, vector<48x3xf32>
    %cst_7 = arith.constant dense<0.000000e+00> : vector<16x3xf32>
    %7 = tpu.matmul %5, %6, %cst_7 {dimension_numbers = #tpu.dot_dimension_numbers<[1], [0], [0], [1], [0, 0, 1, 1], [], []>} : vector<16x48xf32>, vector<48x3xf32>, vector<16x3xf32> -> vector<16x3xf32>
    %c0_8 = arith.constant 0 : index
    %c0_9 = arith.constant 0 : index
    %8 = vector.load %arg5[%c0_8, %c0_9] : memref<48x3xf32, #tpu.memory_space<vmem>>, vector<48x3xf32>
    %cst_10 = arith.constant dense<0.000000e+00> : vector<16x3xf32>
    %9 = tpu.matmul %5, %8, %cst_10 {dimension_numbers = #tpu.dot_dimension_numbers<[1], [0], [0], [1], [0, 0, 1, 1], [], []>} : vector<16x48xf32>, vector<48x3xf32>, vector<16x3xf32> -> vector<16x3xf32>
    %10 = tpu.iota {dimensions = array<i32: 1>} : vector<32x16xi32>
    %c0_11 = arith.constant 0 : index
    %c0_12 = arith.constant 0 : index
    %11 = vector.load %arg8[%c0_11, %c0_12] : memref<32x1xi32, #tpu.memory_space<vmem>>, vector<32x1xi32>
    %12 = vector.broadcast %11 : vector<32x1xi32> to vector<32x16xi32>
    %13 = arith.cmpi eq, %12, %10 : vector<32x16xi32>
    %14 = arith.extui %13 : vector<32x16xi1> to vector<32x16xi32>
    %15 = arith.sitofp %14 : vector<32x16xi32> to vector<32x16xf32>
    %c0_13 = arith.constant 0 : index
    %c0_14 = arith.constant 0 : index
    %16 = vector.load %arg9[%c0_13, %c0_14] : memref<32x1xi32, #tpu.memory_space<vmem>>, vector<32x1xi32>
    %17 = vector.broadcast %16 : vector<32x1xi32> to vector<32x16xi32>
    %18 = arith.cmpi eq, %17, %10 : vector<32x16xi32>
    %19 = arith.extui %18 : vector<32x16xi1> to vector<32x16xi32>
    %20 = arith.sitofp %19 : vector<32x16xi32> to vector<32x16xf32>
    %cst_15 = arith.constant dense<0.000000e+00> : vector<32x3xf32>
    %21 = tpu.matmul %15, %7, %cst_15 {dimension_numbers = #tpu.dot_dimension_numbers<[1], [0], [0], [1], [0, 0, 1, 1], [], []>} : vector<32x16xf32>, vector<16x3xf32>, vector<32x3xf32> -> vector<32x3xf32>
    %cst_16 = arith.constant dense<0.000000e+00> : vector<32x3xf32>
    %22 = tpu.matmul %20, %9, %cst_16 {dimension_numbers = #tpu.dot_dimension_numbers<[1], [0], [0], [1], [0, 0, 1, 1], [], []>} : vector<32x16xf32>, vector<16x3xf32>, vector<32x3xf32> -> vector<32x3xf32>
    %23 = arith.addf %21, %22 : vector<32x3xf32>
    %cst_17 = arith.constant 0.000000e+00 : f32
    %24 = vector.broadcast %cst_17 : f32 to vector<32x3xf32>
    %25 = arith.cmpf ogt, %23, %24 : vector<32x3xf32>
    %cst_18 = arith.constant 2.000000e-01 : f32
    %26 = vector.broadcast %cst_18 : f32 to vector<32x3xf32>
    %27 = arith.mulf %26, %23 : vector<32x3xf32>
    %28 = arith.select %25, %23, %27 : vector<32x3xi1>, vector<32x3xf32>
    %c0_19 = arith.constant 0 : index
    %c0_20 = arith.constant 0 : index
    %29 = vector.load %arg10[%c0_19, %c0_20] : memref<32x3xf32, #tpu.memory_space<vmem>>, vector<32x3xf32>
    %cst_21 = arith.constant 0.000000e+00 : f32
    %30 = vector.broadcast %cst_21 : f32 to vector<32x3xf32>
    %31 = arith.cmpf ogt, %29, %30 : vector<32x3xf32>
    %cst_22 = arith.constant -1.000000e+30 : f32
    %32 = vector.broadcast %cst_22 : f32 to vector<32x3xf32>
    %33 = arith.select %31, %28, %32 : vector<32x3xi1>, vector<32x3xf32>
    %cst_23 = arith.constant 0.000000e+00 : f32
    %34 = vector.broadcast %cst_23 : f32 to vector<32x16xf32>
    %35 = arith.cmpf ogt, %15, %34 : vector<32x16xf32>
    %36 = vector.extract_strided_slice %33 {offsets = [0, 0], sizes = [32, 1], strides = [1, 1]} : vector<32x3xf32> to vector<32x1xf32>
    %cst_24 = arith.constant -1.000000e+30 : f32
    %37 = vector.shape_cast %36 : vector<32x1xf32> to vector<32x1xf32>
    %38 = vector.broadcast %37 : vector<32x1xf32> to vector<32x16xf32>
    %39 = vector.broadcast %cst_24 : f32 to vector<32x16xf32>
    %40 = arith.select %35, %38, %39 : vector<32x16xi1>, vector<32x16xf32>
    %cst_25 = arith.constant dense<0xFF800000> : vector<16xf32>
    %41 = vector.multi_reduction <maximumf>, %40, %cst_25 [0] : vector<32x16xf32> to vector<16xf32>
    %42 = vector.shape_cast %41 : vector<16xf32> to vector<1x16xf32>
    %cst_26 = arith.constant 0.000000e+00 : f32
    %43 = vector.broadcast %cst_26 : f32 to vector<32x16xf32>
    %44 = arith.cmpf ogt, %15, %43 : vector<32x16xf32>
    %45 = vector.extract_strided_slice %33 {offsets = [0, 1], sizes = [32, 1], strides = [1, 1]} : vector<32x3xf32> to vector<32x1xf32>
    %cst_27 = arith.constant -1.000000e+30 : f32
    %46 = vector.shape_cast %45 : vector<32x1xf32> to vector<32x1xf32>
    %47 = vector.broadcast %46 : vector<32x1xf32> to vector<32x16xf32>
    %48 = vector.broadcast %cst_27 : f32 to vector<32x16xf32>
    %49 = arith.select %44, %47, %48 : vector<32x16xi1>, vector<32x16xf32>
    %cst_28 = arith.constant dense<0xFF800000> : vector<16xf32>
    %50 = vector.multi_reduction <maximumf>, %49, %cst_28 [0] : vector<32x16xf32> to vector<16xf32>
    %51 = vector.shape_cast %50 : vector<16xf32> to vector<1x16xf32>
    %cst_29 = arith.constant 0.000000e+00 : f32
    %52 = vector.broadcast %cst_29 : f32 to vector<32x16xf32>
    %53 = arith.cmpf ogt, %15, %52 : vector<32x16xf32>
    %54 = vector.extract_strided_slice %33 {offsets = [0, 2], sizes = [32, 1], strides = [1, 1]} : vector<32x3xf32> to vector<32x1xf32>
    %cst_30 = arith.constant -1.000000e+30 : f32
    %55 = vector.shape_cast %54 : vector<32x1xf32> to vector<32x1xf32>
    %56 = vector.broadcast %55 : vector<32x1xf32> to vector<32x16xf32>
    %57 = vector.broadcast %cst_30 : f32 to vector<32x16xf32>
    %58 = arith.select %53, %56, %57 : vector<32x16xi1>, vector<32x16xf32>
    %cst_31 = arith.constant dense<0xFF800000> : vector<16xf32>
    %59 = vector.multi_reduction <maximumf>, %58, %cst_31 [0] : vector<32x16xf32> to vector<16xf32>
    %60 = vector.shape_cast %59 : vector<16xf32> to vector<1x16xf32>
    %61 = tpu.concatenate %42, %51, %60 in 0 : vector<1x16xf32>, vector<1x16xf32>, vector<1x16xf32> -> vector<3x16xf32>
    %cst_32 = arith.constant dense<0.000000e+00> : vector<32x3xf32>
    %62 = tpu.matmul %15, %61, %cst_32 {dimension_numbers = #tpu.dot_dimension_numbers<[1], [1], [0], [0], [0, 0, 1, 0], [], []>} : vector<32x16xf32>, vector<3x16xf32>, vector<32x3xf32> -> vector<32x3xf32>
    %63 = arith.subf %33, %62 : vector<32x3xf32>
    %cst_33 = arith.constant 0.000000e+00 : f32
    %64 = vector.broadcast %cst_33 : f32 to vector<32x3xf32>
    %65 = arith.minimumf %63, %64 : vector<32x3xf32>
    %66 = math.exp %65 : vector<32x3xf32>
    %67 = arith.mulf %66, %29 : vector<32x3xf32>
    %cst_34 = arith.constant dense<0.000000e+00> : vector<16x3xf32>
    %68 = tpu.matmul %15, %67, %cst_34 {dimension_numbers = #tpu.dot_dimension_numbers<[0], [0], [1], [1], [0, 1, 1, 1], [], []>} : vector<32x16xf32>, vector<32x3xf32>, vector<16x3xf32> -> vector<16x3xf32>
    %cst_35 = arith.constant dense<0.000000e+00> : vector<32x3xf32>
    %69 = tpu.matmul %15, %68, %cst_35 {dimension_numbers = #tpu.dot_dimension_numbers<[1], [0], [0], [1], [0, 0, 1, 1], [], []>} : vector<32x16xf32>, vector<16x3xf32>, vector<32x3xf32> -> vector<32x3xf32>
    %cst_36 = arith.constant 1.000000e-16 : f32
    %70 = vector.broadcast %cst_36 : f32 to vector<32x3xf32>
    %71 = arith.addf %69, %70 : vector<32x3xf32>
    %72 = tpu.reciprocal %71 {approx = true} : vector<32x3xf32> -> vector<32x3xf32>
    %73 = arith.mulf %67, %72 : vector<32x3xf32>
    %cst_37 = arith.constant dense<0.000000e+00> : vector<32x48xf32>
    %74 = tpu.matmul %20, %5, %cst_37 {dimension_numbers = #tpu.dot_dimension_numbers<[1], [0], [0], [1], [0, 0, 1, 1], [], []>} : vector<32x16xf32>, vector<16x48xf32>, vector<32x48xf32> -> vector<32x48xf32>
    %c0_38 = arith.constant 0 : index
    %c0_39 = arith.constant 0 : index
    %75 = vector.load %arg6[%c0_38, %c0_39] : memref<3x48xf32, #tpu.memory_space<vmem>>, vector<3x48xf32>
    %cst_40 = arith.constant dense<0.000000e+00> : vector<32x48xf32>
    %76 = tpu.matmul %73, %75, %cst_40 {dimension_numbers = #tpu.dot_dimension_numbers<[1], [0], [0], [1], [0, 0, 1, 1], [], []>} : vector<32x3xf32>, vector<3x48xf32>, vector<32x48xf32> -> vector<32x48xf32>
    %77 = arith.mulf %74, %76 : vector<32x48xf32>
    %c0_41 = arith.constant 0 : index
    %c0_42 = arith.constant 0 : index
    %78 = vector.load %arg7[%c0_41, %c0_42] : memref<48x16xf32, #tpu.memory_space<vmem>>, vector<48x16xf32>
    %cst_43 = arith.constant dense<0.000000e+00> : vector<32x16xf32>
    %79 = tpu.matmul %77, %78, %cst_43 {dimension_numbers = #tpu.dot_dimension_numbers<[1], [0], [0], [1], [0, 0, 1, 1], [], []>} : vector<32x48xf32>, vector<48x16xf32>, vector<32x16xf32> -> vector<32x16xf32>
    %cst_44 = arith.constant dense<0.000000e+00> : vector<16x16xf32>
    %80 = tpu.matmul %15, %79, %cst_44 {dimension_numbers = #tpu.dot_dimension_numbers<[0], [0], [1], [1], [0, 1, 1, 1], [], []>} : vector<32x16xf32>, vector<32x16xf32>, vector<16x16xf32> -> vector<16x16xf32>
    %c0_45 = arith.constant 0 : index
    %c0_46 = arith.constant 0 : index
    %81 = vector.load %arg11[%c0_45, %c0_46] : memref<16x16xf32, #tpu.memory_space<vmem>>, vector<16x16xf32>
    tpu.vector_store %arg11[%c0_45, %c0_46], %80 {strides = array<i32>} : memref<16x16xf32, #tpu.memory_space<vmem>>, vector<16x16xf32>,
    return
  }
  func.func @transform_0(%arg0: i32) -> (i32, i32) {
    %c0_i32 = arith.constant 0 : i32
    %c0_i32_0 = arith.constant 0 : i32
    %c0_i32_1 = arith.constant 0 : i32
    return %c0_i32, %c0_i32_0 : i32, i32
  }
  func.func @transform_1(%arg0: i32) -> (i32, i32) {
    %c0_i32 = arith.constant 0 : i32
    %c0_i32_0 = arith.constant 0 : i32
    %c0_i32_1 = arith.constant 0 : i32
    return %c0_i32, %c0_i32_0 : i32, i32
  }
  func.func @transform_2(%arg0: i32) -> (i32, i32) {
    %c0_i32 = arith.constant 0 : i32
    %c0_i32_0 = arith.constant 0 : i32
    %c0_i32_1 = arith.constant 0 : i32
    return %c0_i32, %c0_i32_0 : i32, i32
  }
  func.func @transform_3(%arg0: i32) -> (i32, i32) {
    %c0_i32 = arith.constant 0 : i32
    %c0_i32_0 = arith.constant 0 : i32
    %c0_i32_1 = arith.constant 0 : i32
    return %c0_i32, %c0_i32_0 : i32, i32
  }
  func.func @transform_4(%arg0: i32) -> (i32, i32) {
    %c0_i32 = arith.constant 0 : i32
    %c0_i32_0 = arith.constant 0 : i32
    %c0_i32_1 = arith.constant 0 : i32
    return %c0_i32, %c0_i32_0 : i32, i32
  }
  func.func @transform_5(%arg0: i32) -> (i32, i32) {
    %c0_i32 = arith.constant 0 : i32
    %c0_i32_0 = arith.constant 0 : i32
    %c0_i32_1 = arith.constant 0 : i32
    return %c0_i32, %c0_i32_0 : i32, i32
  }
  func.func @transform_6(%arg0: i32) -> (i32, i32) {
    %c0_i32 = arith.constant 0 : i32
    %c0_i32_0 = arith.constant 0 : i32
    %c0_i32_1 = arith.constant 0 : i32
    return %c0_i32, %c0_i32_0 : i32, i32
  }
  func.func @transform_7(%arg0: i32) -> (i32, i32) {
    %c0_i32 = arith.constant 0 : i32
    %c0_i32_0 = arith.constant 0 : i32
    %c0_i32_1 = arith.constant 0 : i32
    return %c0_i32, %c0_i32_0 : i32, i32
  }
  func.func @transform_8(%arg0: i32) -> (i32, i32) {
    %c0_i32 = arith.constant 0 : i32
    %c0_i32_0 = arith.constant 0 : i32
    %c0_i32_1 = arith.constant 0 : i32
    return %c0_i32, %c0_i32_0 : i32, i32
  }
  func.func @transform_9(%arg0: i32) -> (i32, i32) {
    %c0_i32 = arith.constant 0 : i32
    %c0_i32_0 = arith.constant 0 : i32
    %c0_i32_1 = arith.constant 0 : i32
    return %c0_i32, %c0_i32_0 : i32, i32
  }
  func.func @transform_10(%arg0: i32) -> (i32, i32) {
    %c0_i32 = arith.constant 0 : i32
    %c0_i32_0 = arith.constant 0 : i32
    %c0_i32_1 = arith.constant 0 : i32
    return %c0_i32, %c0_i32_0 : i32, i32
  }
}

</mosaic_0001>

<bundles_post_ra>
// kernel: tpu_custom_call.1
= control target key start
LH: loop header
LB: loop body
LE: loop exit
PB: predicated region body
PF: predicated region fallthrough
CT: control target
= control target key end

     0   :  { %vm49_vm0 = vcmask 261120   ;;  %s2080_s0 = inlined_call_operand.vmem [shape: f32[16,32], index: 0, kind: input, shape index: {}]   ;;  %s2081_s1 = inlined_call_operand.vmem [shape: f32[32,48], index: 1, kind: input, shape index: {}]   ;;  %s2082_s2 = inlined_call_operand.vmem [shape: f32[1,48], index: 2, kind: input, shape index: {}]   ;;  %s2083_s3 = inlined_call_operand.vmem [shape: f32[48,3], index: 3, kind: input, shape index: {}]   ;;  %s2084_s4 = inlined_call_operand.vmem [shape: f32[48,3], index: 4, kind: input, shape index: {}]   ;;  %s2085_s5 = inlined_call_operand.vmem [shape: f32[3,48], index: 5, kind: input, shape index: {}]   ;;  %s2086_s6 = inlined_call_operand.vmem [shape: f32[48,16], index: 6, kind: input, shape index: {}]   ;;  %s2087_s7 = inlined_call_operand.vmem [shape: s32[32,1], index: 7, kind: input, shape index: {}]   ;;  %s2088_s8 = inlined_call_operand.vmem [shape: s32[32,1], index: 8, kind: input, shape index: {}]   ;;  %s2089_s9 = inlined_call_operand.vmem [shape: f32[32,3], index: 9, kind: input, shape index: {}]   ;;  %s2090_s10 = inlined_call_operand.hbm [shape: f32[16,16], index: 10, kind: output, shape index: {}]  }
   0x1   :  { %v41_v0 = vld [vmem:[%s2081_s1 + $0x18] sm:$0xff]  ;;  %v40_v1 = vld [vmem:[%s2081_s1 + $0x10] sm:$0xff]  ;;  %v36_v2 = vld [vmem:[%s2080_s0] sm:$0xff] }
   0x2   :  { %1517 = vmatprep.subr.mxu0 %v41_v0  ;;  %v39_v3 = vld [vmem:[%s2081_s1 + $0x8] sm:$0xff]  ;;  %1525 = vmatprep.mubr.msk.f32.mxu0 %vm49_vm0, %v36_v2  ;;  %v135_v5 = vld [vmem:[%s2083_s3 + $0x20] sm:$0xff]  ;;  %v134_v7 = vld [vmem:[%s2083_s3 + $0x18] sm:$0xff] }
   0x3   :  { %1518 = vmatpush3.msra.mxu0 %v41_v0  ;;  %v136_v4 = vld [vmem:[%s2083_s3 + $0x28] sm:$0xff]  ;;  %v38_v6 = vld [vmem:[%s2081_s1] sm:$0xff] }
   0x4   :  { %1519 = vmatprep.subr.mxu0 %v40_v1  ;;  %1528 = vmatprep.subr.mxu1 %v136_v4 }
   0x5   :  { %1520 = vmatpush3.msra.mxu0 %v40_v1  ;;  %1529 = vmatpush3.msra.mxu1 %v136_v4 }
   0x6   :  { %15 = vsyncpa [#allocation3], 0  ;;  %1521 = vmatprep.subr.mxu0 %v39_v3  ;;  %1530 = vmatprep.subr.mxu1 %v135_v5  ;;  %v37_v8 = vld [vmem:[%s2080_s0 + $0x8] sm:$0xff]  ;;  %v223_v10 = vld [vmem:[%s2084_s4 + $0x20] sm:$0xff]  ;;  %v1709_v20 = vmov 0   ;;  %v300_v27 = vlaneseq  ;;  %vm137_vm1 = vcmask 392192  }
   0x7   :  { %1522 = vmatpush3.msra.mxu0 %v39_v3  ;;  %v224_v9 = vld [vmem:[%s2084_s4 + $0x28] sm:$0xff]  ;;  %1531 = vmatpush3.msra.mxu1 %v135_v5  ;;  %v222_v11 = vld [vmem:[%s2084_s4 + $0x18] sm:$0xff]  ;;  %v133_v12 = vld [vmem:[%s2083_s3 + $0x10] sm:$0xff]  ;;  %v1710_v36 = vmov 0.0   ;;  %vm358_vm10 = vcmask 130048  }
   0x8   :  { %1523 = vmatprep.subr.mxu0 %v38_v6  ;;  %1532 = vmatprep.subr.mxu1 %v134_v7  ;;  %v221_v13 = vld [vmem:[%s2084_s4 + $0x10] sm:$0xff]  ;;  %v132_v14 = vld [vmem:[%s2083_s3 + $0x8] sm:$0xff]  ;;  %v131_v16 = vld [vmem:[%s2083_s3] sm:$0xff]  ;;  %v301_v29 = vand.u32 127, %v300_v27 }
   0x9   :  { %1524 = vmatpush3.msra.mxu0 %v38_v6  ;;  %1533 = vmatpush3.msra.mxu1 %v134_v7  ;;  %v220_v15 = vld [vmem:[%s2084_s4 + $0x8] sm:$0xff]  ;;  %v219_v17 = vld [vmem:[%s2084_s4] sm:$0xff]  ;;  %v304_v23 = vld [vmem:[%s2087_s7 + $0x10] sm:$0xff] }
   0xa   :  { %1526 = vmatmul.mubr.msk.f32.vlgmr.msra.gmra.mxu0 %vm49_vm0, %v37_v8  ;;  %1543 = vmatprep.subr.mxu0 %v224_v9  ;;  %v302_v18 = vld [vmem:[%s2087_s7] sm:$0xff]  ;;  %v303_v19 = vld [vmem:[%s2087_s7 + $0x8] sm:$0xff]  ;;  %v332_v24 = vld [vmem:[%s2088_s8 + $0x10] sm:$0xff] }
   0xb   :  { %1544 = vmatpush3.msra.mxu0 %v224_v9  ;;  %1534 = vmatprep.subr.mxu1 %v133_v12  ;;  %v330_v21 = vld [vmem:[%s2088_s8] sm:$0xff]  ;;  %v331_v22 = vld [vmem:[%s2088_s8 + $0x8] sm:$0xff]  ;;  %v305_v25 = vld [vmem:[%s2087_s7 + $0x18] sm:$0xff] }
   0xc   :  { %1545 = vmatprep.subr.mxu0 %v223_v10  ;;  %1535 = vmatpush3.msra.mxu1 %v133_v12  ;;  %v333_v26 = vld [vmem:[%s2088_s8 + $0x18] sm:$0xff]  ;;  %v1390_v30 = vld [vmem:[%s2082_s2] ss:$0 sm:$0xff]  ;;  %v1905_v57 = vld [vmem:[%s2089_s9 + $0x8] sm:$0xff]  ;;  %v1711_v12 = vmov 1  }
   0xd   :  { %1546 = vmatpush3.msra.mxu0 %v223_v10  ;;  %1536 = vmatprep.subr.mxu1 %v132_v14  ;;  %v1910_v61 = vld [vmem:[%s2089_s9] sm:$0xff]  ;;  %vm570_vm12 = vcmp.gt.f32.partialorder %v1905_v57, 0.0 }
   0xe   :  { %1547 = vmatprep.subr.mxu0 %v222_v11  ;;  %1537 = vmatpush3.msra.mxu1 %v132_v14  ;;  %vm569_vm14 = vcmp.gt.f32.partialorder %v1910_v61, 0.0 }
   0xf   :  { %1548 = vmatpush3.msra.mxu0 %v222_v11  ;;  %1538 = vmatprep.subr.mxu1 %v131_v16 }
  0x10   :  { %1549 = vmatprep.subr.mxu0 %v221_v13  ;;  %1539 = vmatpush3.msra.mxu1 %v131_v16  ;;  %v1712_v16 = vmov 2  }
  0x11   :  { %1550 = vmatpush3.msra.mxu0 %v221_v13  ;;  %1661 = vset.pattern.permute.xlu0 %v1709_v20  ;;  %v1923_v13 = vld [vmem:[%s2089_s9 + $0x18] sm:$0xff] }
  0x12   :  { %1551 = vmatprep.subr.mxu0 %v220_v15  ;;  %1662 = vset.pattern.permute.xlu1 %v1709_v20 }
  0x13   :  { %1552 = vmatpush3.msra.mxu0 %v220_v15  ;;  %307 = vperm.xlu0 %1661, %v302_v18  }
  0x14   :  { %1553 = vmatprep.subr.mxu0 %v219_v17  ;;  %310 = vperm.xlu1 %1662, %v303_v19  }
  0x15   :  { %1554 = vmatpush3.msra.mxu0 %v219_v17  ;;  %v1931_v17 = vld [vmem:[%s2089_s9 + $0x10] sm:$0xff] }
  0x17   :  { %335 = vperm.xlu0 %1661, %v330_v21  }
  0x18   :  { %338 = vperm.xlu1 %1662, %v331_v22  }
  0x1b   :  { %313 = vperm.xlu0 %1661, %v304_v23  }
  0x1c   :  { %341 = vperm.xlu1 %1662, %v332_v24  }
  0x1f   :  { %316 = vperm.xlu0 %1661, %v305_v25  }
  0x20   :  { %344 = vperm.xlu1 %1662, %v333_v26  }
  0x8e   :  { %v308_v33 = vpop.permute.xlu0 %307 }
  0x8f   :  { %v311_v34 = vpop.permute.xlu1 %310  ;;  %vm318_vm8 = vcmp.eq.s32.totalorder %v308_v33, %v301_v29 }
  0x90   :  { %vm319_vm2 = vcmp.eq.s32.totalorder %v311_v34, %v301_v29  ;;  %v1880_v49 = vsel %vm318_vm8, 1.0, %v1710_v36 }
  0x91   :  { %v1864_v37 = vsel %vm319_vm2, 1.0, %v1710_v36  ;;  %vm572_vm2 = vcmp.gt.f32.partialorder %v1923_v13, 0.0 }
  0x92   :  { %v336_v38 = vpop.permute.xlu0 %335 }
  0x93   :  { %v339_v39 = vpop.permute.xlu1 %338  ;;  %vm346_vm9 = vcmp.eq.s32.totalorder %v336_v38, %v301_v29 }
  0x94   :  { %vm347_vm3 = vcmp.eq.s32.totalorder %v339_v39, %v301_v29  ;;  %v1882_v50 = vsel %vm346_vm9, 1.0, %v1710_v36  ;;  %vm684_vm9 = vcmask 1040384  }
  0x95   :  { %v1870_v40 = vsel %vm347_vm3, 1.0, %v1710_v36 }
  0x96   :  { %v314_v41 = vpop.permute.xlu0 %313 }
  0x97   :  { %v342_v42 = vpop.permute.xlu1 %341  ;;  %vm320_vm4 = vcmp.eq.s32.totalorder %v314_v41, %v301_v29 }
  0x98   :  { %vm348_vm5 = vcmp.eq.s32.totalorder %v342_v42, %v301_v29  ;;  %v1872_v43 = vsel %vm320_vm4, 1.0, %v1710_v36  ;;  %vm571_vm4 = vcmp.gt.f32.partialorder %v1931_v17, 0.0 }
  0x99   :  { %v1874_v44 = vsel %vm348_vm5, 1.0, %v1710_v36  ;;  %vm577_vm5 = vcmp.gt.f32.partialorder %v1880_v49, 0.0  ;;  %vm579_vm8 = vcmp.gt.f32.partialorder %v1872_v43, 0.0 }
  0x9a   :  { %v317_v45 = vpop.permute.xlu0 %316 }
  0x9b   :  { %v345_v46 = vpop.permute.xlu1 %344  ;;  %vm321_vm6 = vcmp.eq.s32.totalorder %v317_v45, %v301_v29 }
  0x9c   :  { %vm349_vm7 = vcmp.eq.s32.totalorder %v345_v46, %v301_v29  ;;  %v1876_v47 = vsel %vm321_vm6, 1.0, %v1710_v36  ;;  %vm578_vm6 = vcmp.gt.f32.partialorder %v1864_v37, 0.0 }
  0x9d   :  { %v1878_v48 = vsel %vm349_vm7, 1.0, %v1710_v36  ;;  %vm580_vm7 = vcmp.gt.f32.partialorder %v1876_v47, 0.0 }
  0xca   :  { %v1527_v28 = vpop.f32.mrf.mxu0 }
  0xcb   :  { %v1858_v35 = vadd.f32 %v1527_v28, %v1390_v30 }
  0xcc   :  { %v122_v31 = vpop.f32.mrf.mxu0 }
  0xcd   :  { %v1856_v32 = vadd.f32 %v1390_v30, %v122_v31 }
  0xcf   :  { %1540 = vmatprep.mubr.msk.f32.mxu1 %vm137_vm1, %v1856_v32  ;;  %1555 = vmatprep.mubr.msk.f32.mxu0 %vm137_vm1, %v1856_v32 }
  0xd0   :  { %1541 = vmatmul.mubr.msk.f32.vlgmr.msra.gmra.mxu1 %vm137_vm1, %v1858_v35  ;;  %1556 = vmatmul.mubr.msk.f32.vlgmr.msra.gmra.mxu0 %vm137_vm1, %v1858_v35 }
  0xd1   :  { %1562 = vmatprep.mubr.msk.f32.mxu1 %vm358_vm10, %v1882_v50  ;;  %1572 = vmatprep.mubr.msk.f32.mxu0 %vm358_vm10, %v1880_v49 }
 0x190   :  { %v1542_v51 = vpop.f32.mrf.mxu1  ;;  %v1557_v52 = vpop.f32.mrf.mxu0 }
 0x191   :  { %1558 = vmatprep.subr.mxu1 %v1557_v52  ;;  %1568 = vmatprep.subr.mxu0 %v1542_v51 }
 0x192   :  { %v210_v53 = vpop.f32.mrf.mxu1  ;;  %v291_v54 = vpop.f32.mrf.mxu0  ;;  %1559 = vmatpush3.msra.mxu1 %v1557_v52  ;;  %1569 = vmatpush3.msra.mxu0 %v1542_v51 }
 0x193   :  { %1560 = vmatprep.subr.mxu1 %v291_v54  ;;  %1570 = vmatprep.subr.mxu0 %v210_v53 }
 0x194   :  { %1561 = vmatpush3.msra.mxu1 %v291_v54  ;;  %1571 = vmatpush3.msra.mxu0 %v210_v53 }
 0x195   :  { %1563 = vmatmul.mubr.msk.f32.vlgmr.msra.gmra.mxu1 %vm358_vm10, %v1870_v40  ;;  %1573 = vmatmul.mubr.msk.f32.vlgmr.msra.gmra.mxu0 %vm358_vm10, %v1864_v37 }
 0x196   :  { %1565 = vmatprep.mubr.msk.f32.mxu1 %vm358_vm10, %v1874_v44  ;;  %1575 = vmatprep.mubr.msk.f32.mxu0 %vm358_vm10, %v1872_v43 }
 0x199   :  { %1566 = vmatmul.mubr.msk.f32.gmra.mxu1 %vm358_vm10, %v1878_v48  ;;  %1576 = vmatmul.mubr.msk.f32.gmra.mxu0 %vm358_vm10, %v1876_v47 }
 0x19a   :  { %1580 = vmatprep.mubr.msk.f32.mxu1 %vm358_vm10, %v1880_v49 }
 0x255   :  { %v1564_v55 = vpop.f32.mrf.mxu1  ;;  %v1574_v56 = vpop.f32.mrf.mxu0 }
 0x256   :  { %v540_v58 = vadd.f32 %v1574_v56, %v1564_v55 }
 0x257   :  { %v437_v59 = vpop.f32.mrf.mxu1  ;;  %v534_v60 = vpop.f32.mrf.mxu0 }
 0x258   :  { %vm554_vm11 = vcmp.gt.f32.partialorder %v540_v58, 0.0  ;;  %v558_v62 = vmul.f32 0.2, %v540_v58  ;;  %v535_v63 = vadd.f32 %v534_v60, %v437_v59 }
 0x259   :  { %v1567_v0 = vpop.f32.mrf.mxu1  ;;  %v1577_v1 = vpop.f32.mrf.mxu0 }
 0x25a   :  { %vm553_vm13 = vcmp.gt.f32.partialorder %v535_v63, 0.0  ;;  %v557_v2 = vmul.f32 0.2, %v535_v63  ;;  %v562_v3 = vsel %vm554_vm11, %v540_v58, %v558_v62  ;;  %v550_v4 = vadd.f32 %v1577_v1, %v1567_v0 }
 0x25b   :  { %v1914_v5 = vsel %vm570_vm12, %v562_v3, -1e+30  ;;  %v447_v7 = vpop.f32.mrf.mxu1  ;;  %v544_v8 = vpop.f32.mrf.mxu0  ;;  %vm686_vm11 = vcmask 1041408   ;;  %vm1101_vm12 = vcmask 1042432  }
 0x25c   :  { %588 = vperm.xlu1 %1662, %v1914_v5   ;;  %v561_v6 = vsel %vm553_vm13, %v535_v63, %v557_v2  ;;  %v560_v10 = vmul.f32 0.2, %v550_v4  ;;  %vm556_vm15 = vcmp.gt.f32.partialorder %v550_v4, 0.0  ;;  %v545_v11 = vadd.f32 %v544_v8, %v447_v7 }
 0x25d   :  { %v1917_v9 = vsel %vm569_vm14, %v561_v6, -1e+30  ;;  %vm1088_vm13 = vcmask 23552  }
 0x25e   :  { %583 = vperm.xlu0 %1661, %v1917_v9   ;;  %v564_v14 = vsel %vm556_vm15, %v550_v4, %v560_v10  ;;  %v559_v15 = vmul.f32 0.2, %v545_v11  ;;  %vm555_vm3 = vcmp.gt.f32.partialorder %v545_v11, 0.0 }
 0x25f   :  { %v1934_v18 = vsel %vm572_vm2, %v564_v14, -1e+30 }
 0x260   :  { %1663 = vset.pattern.permute.xlu1 %v1711_v12  ;;  %v563_v19 = vsel %vm555_vm3, %v545_v11, %v559_v15 }
 0x261   :  { %623 = vperm.xlu1 %1663, %v1914_v5   ;;  %v1941_v21 = vsel %vm571_vm4, %v563_v19, -1e+30 }
 0x262   :  { %1664 = vset.pattern.permute.xlu0 %v1711_v12 }
 0x263   :  { %619 = vperm.xlu0 %1664, %v1917_v9  }
 0x265   :  { %1665 = vset.pattern.permute.xlu1 %v1712_v16 }
 0x266   :  { %652 = vperm.xlu1 %1665, %v1917_v9  }
 0x267   :  { %631 = vperm.xlu0 %1664, %v1934_v18  }
 0x26a   :  { %1666 = vset.pattern.permute.xlu1 %v1709_v20 }
 0x26b   :  { %1667 = vset.pattern.permute.xlu0 %v1709_v20  ;;  %598 = vperm.xlu1 %1666, %v1934_v18  }
 0x26c   :  { %593 = vperm.xlu0 %1667, %v1941_v21  }
 0x26f   :  { %1669 = vset.pattern.permute.xlu1 %v1711_v12 }
 0x270   :  { %627 = vperm.xlu1 %1669, %v1941_v21   ;;  %1668 = vset.pattern.permute.xlu0 %v1712_v16 }
 0x271   :  { %656 = vperm.xlu0 %1668, %v1914_v5  }
 0x274   :  { %1670 = vset.pattern.permute.xlu1 %v1712_v16 }
 0x275   :  { %660 = vperm.xlu1 %1670, %v1941_v21  }
 0x279   :  { %664 = vperm.xlu1 %1670, %v1934_v18  }
 0x28f   :  { %796 = vxpose.xlu0.b32.start [1/4] (short) (narrow) %v1880_v49, 16 }
 0x293   :  { %797 = vxpose.xlu0.b32.cont [2/4] (short) (narrow) %v1864_v37, 16 }
 0x297   :  { %798 = vxpose.xlu0.b32.cont [3/4] (short) (narrow) %v1872_v43, 16 }
 0x29b   :  { %799 = vxpose.xlu0.b32.end [4/4] (short) (narrow) %v1876_v47, 16 }
 0x2d7   :  { %v589_v20 = vpop.permute.xlu1 %588 }
 0x2d8   :  { %v602_v28 = vsel %vm578_vm6, %v589_v20, -1e+30 }
 0x2d9   :  { %v584_v22 = vpop.permute.xlu0 %583  ;;  %v606_v39 = vsel %vm358_vm10, %v602_v28, -inf }
 0x2da   :  { %v601_v27 = vsel %vm577_vm5, %v584_v22, -1e+30 }
 0x2db   :  { %v605_v30 = vsel %vm358_vm10, %v601_v27, -inf }
 0x2dc   :  { %v624_v23 = vpop.permute.xlu1 %623  ;;  %v609_v42 = vmax.f32 %v605_v30, %v606_v39 }
 0x2dd   :  { %v635_v45 = vsel %vm578_vm6, %v624_v23, -1e+30 }
 0x2de   :  { %v620_v24 = vpop.permute.xlu0 %619  ;;  %v639_v56 = vsel %vm358_vm10, %v635_v45, -inf }
 0x2df   :  { %v634_v34 = vsel %vm577_vm5, %v620_v24, -1e+30 }
 0x2e0   :  { %v638_v52 = vsel %vm358_vm10, %v634_v34, -inf }
 0x2e1   :  { %v653_v25 = vpop.permute.xlu1 %652  ;;  %v642_v60 = vmax.f32 %v638_v52, %v639_v56 }
 0x2e2   :  { %v632_v26 = vpop.permute.xlu0 %631  ;;  %v667_v6 = vsel %vm577_vm5, %v653_v25, -1e+30 }
 0x2e3   :  { %v637_v46 = vsel %vm580_vm7, %v632_v26, -1e+30  ;;  %v671_v15 = vsel %vm358_vm10, %v667_v6, -inf }
 0x2e4   :  { %v641_v58 = vsel %vm358_vm10, %v637_v46, -inf }
 0x2e6   :  { %v599_v29 = vpop.permute.xlu1 %598 }
 0x2e7   :  { %v604_v31 = vsel %vm580_vm7, %v599_v29, -1e+30  ;;  %v594_v33 = vpop.permute.xlu0 %593 }
 0x2e8   :  { %v608_v36 = vsel %vm358_vm10, %v604_v31, -inf  ;;  %v603_v38 = vsel %vm579_vm8, %v594_v33, -1e+30 }
 0x2e9   :  { %v607_v41 = vsel %vm358_vm10, %v603_v38, -inf }
 0x2ea   :  { %v610_v51 = vmax.f32 %v607_v41, %v608_v36 }
 0x2eb   :  { %v628_v53 = vpop.permute.xlu1 %627 }
 0x2ec   :  { %v611_v54 = vmax.f32 %v609_v42, %v610_v51  ;;  %v636_v55 = vsel %vm579_vm8, %v628_v53, -1e+30  ;;  %v657_v63 = vpop.permute.xlu0 %656 }
 0x2ed   :  { %v640_v59 = vsel %vm358_vm10, %v636_v55, -inf  ;;  %v668_v3 = vsel %vm578_vm6, %v657_v63, -1e+30 }
 0x2ee   :  { %v643_v62 = vmax.f32 %v640_v59, %v641_v58  ;;  %v612_v0 = vrot.slane %v611_v54, 4  ;;  %v672_v11 = vsel %vm358_vm10, %v668_v3, -inf }
 0x2ef   :  { %v675_v22 = vmax.f32 %v671_v15, %v672_v11 }
 0x2f0   :  { %v644_v1 = vmax.f32 %v642_v60, %v643_v62  ;;  %v661_v2 = vpop.permute.xlu1 %660  ;;  %v613_v8 = vmax.f32 %v611_v54, %v612_v0 }
 0x2f1   :  { %v669_v7 = vsel %vm579_vm8, %v661_v2, -1e+30 }
 0x2f2   :  { %v645_v4 = vrot.slane %v644_v1, 4  ;;  %v673_v19 = vsel %vm358_vm10, %v669_v7, -inf  ;;  %v614_v24 = vrot.slane %v613_v8, 2 }
 0x2f4   :  { %v646_v10 = vmax.f32 %v644_v1, %v645_v4  ;;  %v665_v12 = vpop.permute.xlu1 %664  ;;  %v615_v28 = vmax.f32 %v613_v8, %v614_v24  ;;  %v1196_v24 = vld [vmem:[%s2086_s6 + $0x10] sm:$0xff] }
 0x2f5   :  { %v670_v14 = vsel %vm580_vm7, %v665_v12, -1e+30 }
 0x2f6   :  { %v647_v16 = vrot.slane %v646_v10, 2  ;;  %v674_v20 = vsel %vm358_vm10, %v670_v14, -inf  ;;  %v616_v33 = vrot.slane %v615_v28, 1 }
 0x2f7   :  { %v676_v23 = vmax.f32 %v673_v19, %v674_v20 }
 0x2f8   :  { %v648_v26 = vmax.f32 %v646_v10, %v647_v16  ;;  %v617_v39 = vmax.f32 %v615_v28, %v616_v33 }
 0x2f9   :  { %v677_v25 = vmax.f32 %v675_v22, %v676_v23 }
 0x2fa   :  { %v649_v30 = vrot.slane %v648_v26, 1 }
 0x2fb   :  { %v678_v27 = vrot.slane %v677_v25, 4 }
 0x2fc   :  { %v650_v36 = vmax.f32 %v648_v26, %v649_v30  ;;  %v1194_v26 = vld [vmem:[%s2086_s6] sm:$0xff] }
 0x2fd   :  { %v679_v29 = vmax.f32 %v677_v25, %v678_v27  ;;  %v1195_v25 = vld [vmem:[%s2086_s6 + $0x8] sm:$0xff] }
 0x2fe   :  { %v685_v42 = vsel %vm684_vm9, %v617_v39, %v650_v36 }
 0x2ff   :  { %v680_v31 = vrot.slane %v679_v29, 2 }
 0x301   :  { %v681_v34 = vmax.f32 %v679_v29, %v680_v31 }
 0x303   :  { %v682_v38 = vrot.slane %v681_v34, 1 }
 0x305   :  { %v683_v41 = vmax.f32 %v681_v34, %v682_v38 }
 0x307   :  { %v687_v45 = vsel %vm686_vm11, %v685_v42, %v683_v41 }
 0x308   :  { %1578 = vmatprep.subr.msk.mxu1 %vm358_vm10, %v687_v45 }
 0x309   :  { %1579 = vmatpush3.xpose.msk.msra.mxu1 %vm358_vm10, %v687_v45 }
 0x30b   :  { %v2002_v46 = vpop.trf.xlu0 }
 0x30c   :  { %1581 = vmatmul.mubr.msk.f32.vlgmr.msra.gmra.mxu1 %vm358_vm10, %v1864_v37  ;;  %1594 = vmatprep.mubr.msk.f32.mxu0 %vm49_vm0, %v2002_v46 }
 0x30d   :  { %1583 = vmatprep.mubr.msk.f32.mxu1 %vm358_vm10, %v1872_v43 }
 0x310   :  { %1584 = vmatmul.mubr.msk.f32.gmra.mxu1 %vm358_vm10, %v1876_v47 }
 0x311   :  { %1601 = vmatprep.mubr.msk.f32.mxu1 %vm358_vm10, %v1880_v49 }
 0x3cc   :  { %v1582_v51 = vpop.f32.mrf.mxu1 }
 0x3cd   :  { %v777_v52 = vsub.f32 %v1914_v5, %v1582_v51 }
 0x3ce   :  { %v757_v53 = vpop.f32.mrf.mxu1 }
 0x3cf   :  { %v776_v54 = vsub.f32 %v1917_v9, %v757_v53  ;;  %v781_v55 = vmin.f32 %v777_v52, 0.0 }
 0x3d0   :  { %v1585_v56 = vpop.f32.mrf.mxu1 }
 0x3d1   :  { %v779_v58 = vsub.f32 %v1934_v18, %v1585_v56  ;;  %v780_v60 = vmin.f32 %v776_v54, 0.0  ;;  %v786_v63 = vmul.f32 1.442695, %v781_v55 }
 0x3d2   :  { %v767_v59 = vpop.f32.mrf.mxu1 }
 0x3d3   :  { %v783_v62 = vmin.f32 %v779_v58, 0.0  ;;  %v778_v49 = vsub.f32 %v1941_v21, %v767_v59  ;;  %v784_v2 = vmul.f32 1.442695, %v780_v60 }
 0x3d5   :  { %v790_v0 = vmul.f32 1.442695, %v783_v62  ;;  %v782_v1 = vmin.f32 %v778_v49, 0.0 }
 0x3d7   :  { %1671 = vpow2.f32 %v790_v0  ;;  %v788_v3 = vmul.f32 1.442695, %v782_v1 }
 0x3d8   :  { %1673 = vpow2.f32 %v786_v63 }
 0x3d9   :  { %1675 = vpow2.f32 %v788_v3 }
 0x3da   :  { %1677 = vpow2.f32 %v784_v2 }
 0x3e4   :  { %v1672_v5 = vpop.eup %1671 }
 0x3e5   :  { %v1674_v9 = vpop.eup %1673  ;;  %v2011_v4 = vmul.f32 %v1672_v5, %v1923_v13  ;;  %v2022_v13 = vpop.trf.xlu0 }
 0x3e6   :  { %v1676_v18 = vpop.eup %1675  ;;  %v793_v7 = vmul.f32 %v1674_v9, %v1905_v57 }
 0x3e7   :  { %1586 = vmatprep.subr.mxu0 %v2011_v4  ;;  %v2015_v6 = vmul.f32 %v1676_v18, %v1931_v17  ;;  %v1678_v21 = vpop.eup %1677 }
 0x3e8   :  { %1587 = vmatpush3.msra.mxu0 %v2011_v4  ;;  %v792_v8 = vmul.f32 %v1678_v21, %v1910_v61 }
 0x3e9   :  { %1588 = vmatprep.subr.mxu0 %v2015_v6 }
 0x3ea   :  { %1589 = vmatpush3.msra.mxu0 %v2015_v6 }
 0x3eb   :  { %1590 = vmatprep.subr.mxu0 %v793_v7 }
 0x3ec   :  { %1591 = vmatpush3.msra.mxu0 %v793_v7 }
 0x3ed   :  { %1592 = vmatprep.subr.mxu0 %v792_v8 }
 0x3ee   :  { %1593 = vmatpush3.msra.mxu0 %v792_v8 }
 0x3ef   :  { %1595 = vmatmul.mubr.msk.f32.vlgmr.msra.gmra.mxu0 %vm49_vm0, %v2022_v13  ;;  %1607 = vmatprep.subr.mxu0 %v1858_v35 }
 0x3f0   :  { %1608 = vmatpush3.msra.mxu0 %v1858_v35  ;;  %1611 = vmatprep.mubr.msk.f32.mxu0 %vm358_vm10, %v1882_v50  ;;  %v1199_v35 = vld [vmem:[%s2086_s6 + $0x28] sm:$0xff] }
 0x3f1   :  { %1609 = vmatprep.subr.mxu0 %v1856_v32 }
 0x3f2   :  { %1610 = vmatpush3.msra.mxu0 %v1856_v32  ;;  %v1087_v32 = vld [vmem:[%s2085_s5] sm:$0x7] }
 0x3f3   :  { %1612 = vmatmul.mubr.msk.f32.vlgmr.msra.gmra.mxu0 %vm358_vm10, %v1870_v40  ;;  %1625 = vmatprep.subr.mxu0 %v1199_v35  ;;  %v1197_v40 = vld [vmem:[%s2086_s6 + $0x18] sm:$0xff] }
 0x3f4   :  { %1614 = vmatprep.mubr.msk.f32.mxu0 %vm358_vm10, %v1874_v44  ;;  %1626 = vmatpush3.msra.mxu0 %v1199_v35 }
 0x3f7   :  { %1615 = vmatmul.mubr.msk.f32.gmra.mxu0 %vm358_vm10, %v1878_v48 }
 0x4af   :  { %v1596_v57 = vpop.f32.mrf.mxu0 }
 0x4b0   :  { %1597 = vmatprep.subr.mxu1 %v1596_v57 }
 0x4b1   :  { %v900_v61 = vpop.f32.mrf.mxu0  ;;  %1598 = vmatpush3.msra.mxu1 %v1596_v57 }
 0x4b2   :  { %1599 = vmatprep.subr.mxu1 %v900_v61 }
 0x4b3   :  { %1600 = vmatpush3.msra.mxu1 %v900_v61  ;;  %v1613_v27 = vpop.f32.mrf.mxu0 }
 0x4b4   :  { %1602 = vmatmul.mubr.msk.f32.vlgmr.msra.gmra.mxu1 %vm358_vm10, %v1864_v37  ;;  %1617 = vmatprep.subr.msk.mxu1 %vm1101_vm12, %v1087_v32  ;;  %v1198_v37 = vld [vmem:[%s2086_s6 + $0x20] sm:$0xff]  ;;  %s1713_s6 = smov [#allocation2]  }
 0x4b5   :  { %1604 = vmatprep.mubr.msk.f32.mxu1 %vm358_vm10, %v1872_v43  ;;  %1618 = vmatpush3.msk.msra.mxu1 %vm1101_vm12, %v1087_v32  ;;  %v1068_v28 = vpop.f32.mrf.mxu0  ;;  %s1379_s15 = sshll.u32 %s1713_s6, 4  ;;  %s1380_s15 = int_to_ptr.vmem [resolvable:$true] %s1379_s15 }
 0x4b6   :  { %1627 = vmatprep.subr.mxu0 %v1198_v37  ;;  %s1687_s0 = scalar_lea.vmem %s1380_s15, 256  ;;  %p1692_p1 = scmp.lt.s32.totalorder %s1380_s15, %s1380_s15 }
 0x4b7   :  { %1628 = vmatpush3.msra.mxu0 %v1198_v37  ;;  %v1616_v30 = vpop.f32.mrf.mxu0  ;;  %p1688_p0 = scmp.ne.s32.totalorder %s1380_s15, %s1687_s0  ;;  %p1693_p2 = scmp.lt.s32.totalorder %s1687_s0, %s1687_s0 }
 0x4b8   :  { %1605 = vmatmul.mubr.msk.f32.gmra.mxu1 %vm358_vm10, %v1876_v47  ;;  %1629 = vmatprep.subr.mxu0 %v1197_v40 }
 0x4b9   :  { %1630 = vmatpush3.msra.mxu0 %v1197_v40  ;;  %v1078_v38 = vpop.f32.mrf.mxu0  ;;  %p1694_p3 = por %p1693_p2, %p1692_p1 }
 0x4ba   :  { %1631 = vmatprep.subr.mxu0 %v1196_v24 }
 0x4bb   :  { %1632 = vmatpush3.msra.mxu0 %v1196_v24  ;;  %p1695_p4 = pnand %p1694_p3, %p1688_p0 }
 0x4bc   :  { %1633 = vmatprep.subr.mxu0 %v1195_v25 }
 0x4bd   :  { %1634 = vmatpush3.msra.mxu0 %v1195_v25 }
 0x4be   :  { %1635 = vmatprep.subr.mxu0 %v1194_v26 }
 0x4bf   :  { %1636 = vmatpush3.msra.mxu0 %v1194_v26 }
 0x574   :  { %v1603_v43 = vpop.f32.mrf.mxu1 }
 0x575   :  { %v981_v44 = vadd.f32 1e-16, %v1603_v43 }
 0x576   :  { %v975_v47 = vpop.f32.mrf.mxu1 }
 0x577   :  { %v976_v48 = vadd.f32 1e-16, %v975_v47  ;;  %1679 = vrcp.f32 %v981_v44 }
 0x578   :  { %v1606_v50 = vpop.f32.mrf.mxu1 }
 0x579   :  { %1681 = vrcp.f32 %v976_v48  ;;  %v991_v17 = vadd.f32 1e-16, %v1606_v50 }
 0x57a   :  { %v985_v10 = vpop.f32.mrf.mxu1 }
 0x57b   :  { %v986_v11 = vadd.f32 1e-16, %v985_v10  ;;  %1683 = vrcp.f32 %v991_v17 }
 0x57d   :  { %1685 = vrcp.f32 %v986_v11 }
 0x584   :  { %v1680_v12 = vpop.eup %1679 }
 0x585   :  { %v999_v16 = vmul.f32 %v1680_v12, %v793_v7 }
 0x586   :  { %v1682_v14 = vpop.eup %1681 }
 0x587   :  { %v998_v15 = vmul.f32 %v1682_v14, %v792_v8 }
 0x588   :  { %v1684_v19 = vpop.eup %1683 }
 0x589   :  { %1619 = vmatprep.mubr.msk.f32.mxu1 %vm1088_vm13, %v998_v15  ;;  %v1001_v23 = vmul.f32 %v1684_v19, %v2011_v4 }
 0x58a   :  { %v1686_v20 = vpop.eup %1685  ;;  %1620 = vmatmul.mubr.msk.f32.vlgmr.msra.gmra.mxu1 %vm1088_vm13, %v999_v16 }
 0x58b   :  { %v1000_v22 = vmul.f32 %v1686_v20, %v2015_v6 }
 0x58d   :  { %1622 = vmatprep.mubr.msk.f32.mxu1 %vm1088_vm13, %v1000_v22 }
 0x58e   :  { %1623 = vmatmul.mubr.msk.f32.gmra.mxu1 %vm1088_vm13, %v1001_v23 }
 0x58f   :  { %1651 = vmatprep.mubr.msk.f32.mxu1 %vm49_vm0, %v2002_v46 }
 0x64a   :  { %v1621_v29 = vpop.f32.mrf.mxu1 }
 0x64b   :  { %v1191_v34 = vmul.f32 %v1621_v29, %v1613_v27 }
 0x64c   :  { %v1171_v31 = vpop.f32.mrf.mxu1 }
 0x64d   :  { %v1190_v33 = vmul.f32 %v1171_v31, %v1068_v28 }
 0x64e   :  { %v1624_v36 = vpop.f32.mrf.mxu1 }
 0x64f   :  { %1637 = vmatprep.mubr.msk.f32.mxu0 %vm137_vm1, %v1190_v33  ;;  %v1193_v42 = vmul.f32 %v1624_v36, %v1616_v30 }
 0x650   :  { %v1181_v39 = vpop.f32.mrf.mxu1  ;;  %1638 = vmatmul.mubr.msk.f32.vlgmr.msra.gmra.mxu0 %vm137_vm1, %v1191_v34 }
 0x651   :  { %v1192_v41 = vmul.f32 %v1181_v39, %v1078_v38 }
 0x653   :  { %1640 = vmatprep.mubr.msk.f32.mxu0 %vm137_vm1, %v1192_v41 }
 0x654   :  { %1641 = vmatmul.mubr.msk.f32.gmra.mxu0 %vm137_vm1, %v1193_v42 }
 0x710   :  { %v1639_v45 = vpop.f32.mrf.mxu0 }
 0x712   :  { %v1278_v46 = vpop.f32.mrf.mxu0 }
 0x714   :  { %v1642_v51 = vpop.f32.mrf.mxu0 }
 0x715   :  { %1643 = vmatprep.subr.mxu1 %v1642_v51 }
 0x716   :  { %v1288_v52 = vpop.f32.mrf.mxu0  ;;  %1644 = vmatpush3.msra.mxu1 %v1642_v51 }
 0x717   :  { %1645 = vmatprep.subr.mxu1 %v1288_v52 }
 0x718   :  { %1646 = vmatpush3.msra.mxu1 %v1288_v52 }
 0x719   :  { %1647 = vmatprep.subr.mxu1 %v1639_v45 }
 0x71a   :  { %1648 = vmatpush3.msra.mxu1 %v1639_v45 }
 0x71b   :  { %1649 = vmatprep.subr.mxu1 %v1278_v46 }
 0x71c   :  { %1650 = vmatpush3.msra.mxu1 %v1278_v46 }
 0x71d   :  { %1652 = vmatmul.mubr.msk.f32.vlgmr.msra.gmra.mxu1 %vm49_vm0, %v2022_v13 }
 0x7dd   :  { %v1653_v53 = vpop.f32.mrf.mxu1 }
 0x7de   :  { %1373 = vst.msk [vmem:[#allocation2 + $0x8] sm:$0xff] %vm358_vm10, %v1653_v53 }
 0x7df   :  { %v1363_v54 = vpop.f32.mrf.mxu1 }
 0x7e0   :  { %1372 = vst.msk [vmem:[#allocation2] sm:$0xff] %vm358_vm10, %v1363_v54 }
 0x7e1   :  { %1698 = shalt.err (!%p1695_p4)
}
 0x7e2   :  { %s1714_s16 = smov 128   ;;  %s1715_s17 = smov 8  }
 0x7e3   :  { %1385 = dma.vmem_to_hbm [thread:$0]  %s1380_s15, 256, %s2090_s10, [#allocation3], %s1714_s16, %s1714_s16, %s1715_s17  }
 0x7e4   :  { %1707 = dma.done.wait [#allocation3], 256  }
 0x7e5   :  { %1708 = vsyncadd [#allocation3], 4294967040 }
 0x7e6   :  { %1389 = vsyncpa [#allocation3], 1 }

</bundles_post_ra>
